<compile_context>
chip_gen: v7x
topology: tpu7x:2x2x1
jax: 0.10.0
libtpu: 0.0.40
codegen_flags: <defaults>
</compile_context>

<pallas_src>
import functools
import math

import jax
import jax.numpy as jnp
from jax import lax
from jax.experimental import pallas as pl
from jax.experimental.pallas import tpu as pltpu

_LN_EPS = 1e-12


def _round_up(x, m):
    return ((x + m - 1) // m) * m


def _gelu_tanh(x):
    # TODO(synk): nn.GELU / BERT use the erf form; tanh approximation used for safe TPU lowering.
    c = math.sqrt(2.0 / math.pi)
    return 0.5 * x * (1.0 + jnp.tanh(c * (x + 0.044715 * x * x * x)))


# ----------------------------------------------------------------------------
# Kernel 1: fused BERT embeddings — DMA row gather + pos + type + LayerNorm
# ----------------------------------------------------------------------------
def _bert_embeddings_kernel(tok_ref, pos_ref, typ_ref, g_ref, b_ref, wemb_hbm,
                            out_ref, rows, sems, *, ln_eps):
    """Grid = (B,). One batch row per step.

    tok_ref : (B, S) int32 in SMEM (scalar prefetch)
    pos_ref : (S, H)   position rows [0, S)       (resident across grid)
    typ_ref : (1, H)   token-type-0 row
    g_ref/b_ref: (1,H) LayerNorm gamma / beta
    wemb_hbm: (V, H)   word table, stays in HBM (memory_space=pl.ANY)
    out_ref : (1, S, H)
    rows    : (S, H) VMEM scratch gather buffer
    sems    : (S,)   DMA semaphores (S row copies in flight)
    """
    b = pl.program_id(0)
    S = rows.shape[0]

    @pl.loop(0, S, unroll=True)
    def _issue(s):
        tok = tok_ref[b, s]
        pltpu.make_async_copy(wemb_hbm.at[pl.ds(tok, 1), :],
                              rows.at[pl.ds(s, 1), :],
                              sems.at[s]).start()

    @pl.loop(0, S, unroll=True)
    def _wait(s):
        pltpu.make_async_copy(wemb_hbm.at[pl.ds(0, 1), :],
                              rows.at[pl.ds(s, 1), :],
                              sems.at[s]).wait()

    x = (rows[...].astype(jnp.float32)
         + pos_ref[...].astype(jnp.float32)
         + typ_ref[...].astype(jnp.float32))
    mean = jnp.mean(x, axis=-1, keepdims=True)
    var = jnp.mean(jnp.square(x - mean), axis=-1, keepdims=True)
    y = (x - mean) * lax.rsqrt(var + ln_eps)
    y = y * g_ref[...].astype(jnp.float32) + b_ref[...].astype(jnp.float32)
    out_ref[0] = y.astype(out_ref.dtype)


def bert_embeddings_pallas(token_ids, word_emb, pos_emb, type_emb, ln_gamma, ln_beta,
                           *, ln_eps=_LN_EPS, out_dtype=jnp.bfloat16):
    """token_ids (B,S) int -> (B,S,H). Exact DMA row gather (O(B*S*H) bytes)."""
    B, S = token_ids.shape
    V, H = word_emb.shape
    tok = token_ids.astype(jnp.int32)
    return pl.pallas_call(
        functools.partial(_bert_embeddings_kernel, ln_eps=ln_eps),
        out_shape=jax.ShapeDtypeStruct((B, S, H), out_dtype),
        grid_spec=pltpu.PrefetchScalarGridSpec(
            num_scalar_prefetch=1,                      # token ids land in SMEM
            grid=(B,),
            in_specs=[
                pl.BlockSpec((S, H), lambda b, tok: (0, 0)),   # pos rows (resident)
                pl.BlockSpec((1, H), lambda b, tok: (0, 0)),   # token-type-0 row
                pl.BlockSpec((1, H), lambda b, tok: (0, 0)),   # gamma
                pl.BlockSpec((1, H), lambda b, tok: (0, 0)),   # beta
                pl.BlockSpec(memory_space=pl.ANY),             # word table stays in HBM
            ],
            out_specs=pl.BlockSpec((1, S, H), lambda b, tok: (b, 0, 0)),
            scratch_shapes=[pltpu.VMEM((S, H), word_emb.dtype),
                            pltpu.SemaphoreType.DMA((S,))],
        ),
        compiler_params=pltpu.CompilerParams(dimension_semantics=("parallel",)),
    )(tok, pos_emb[:S], type_emb[:1], ln_gamma.reshape(1, H), ln_beta.reshape(1, H), word_emb)


# ----------------------------------------------------------------------------
# Kernel 2: fused linear (+ bias, + optional tanh-approx GELU), bf16 MXU / f32 acc
# ----------------------------------------------------------------------------
def _linear_kernel(x_ref, w_ref, b_ref, out_ref, *, activation):
    y = jnp.dot(x_ref[...], w_ref[...], preferred_element_type=jnp.float32)
    y = y + b_ref[...].astype(jnp.float32)
    if activation == "gelu":
        y = _gelu_tanh(y)
    out_ref[...] = y.astype(out_ref.dtype)


def linear_pallas(x, w, b, *, activation=None, out_dtype=None, row_block=256):
    N, K = x.shape
    M = w.shape[1]
    out_dtype = x.dtype if out_dtype is None else out_dtype
    TN = min(row_block, _round_up(N, 8))
    Np = _round_up(N, TN)
    xp = jnp.pad(x, ((0, Np - N), (0, 0))) if Np != N else x
    out = pl.pallas_call(
        functools.partial(_linear_kernel, activation=activation),
        out_shape=jax.ShapeDtypeStruct((Np, M), out_dtype),
        grid_spec=pltpu.PrefetchScalarGridSpec(
            num_scalar_prefetch=0,
            grid=(Np // TN,),
            in_specs=[
                pl.BlockSpec((TN, K), lambda i: (i, 0)),
                pl.BlockSpec((K, M), lambda i: (0, 0)),    # weights resident across row tiles
                pl.BlockSpec((1, M), lambda i: (0, 0)),
            ],
            out_specs=pl.BlockSpec((TN, M), lambda i: (i, 0)),
        ),
        compiler_params=pltpu.CompilerParams(dimension_semantics=("parallel",)),
    )(xp, w, b.reshape(1, M))
    return out[:N] if Np != N else out


# ----------------------------------------------------------------------------
# Kernel 3: fused linear + bias + residual + LayerNorm
# ----------------------------------------------------------------------------
def _linear_res_ln_kernel(x_ref, w_ref, b_ref, res_ref, g_ref, be_ref, out_ref, *, eps):
    y = jnp.dot(x_ref[...], w_ref[...], preferred_element_type=jnp.float32)
    y = y + b_ref[...].astype(jnp.float32) + res_ref[...].astype(jnp.float32)
    mean = jnp.mean(y, axis=-1, keepdims=True)
    var = jnp.mean(jnp.square(y - mean), axis=-1, keepdims=True)
    y = (y - mean) * lax.rsqrt(var + eps)
    y = y * g_ref[...].astype(jnp.float32) + be_ref[...].astype(jnp.float32)
    out_ref[...] = y.astype(out_ref.dtype)


def linear_res_ln_pallas(x, w, b, residual, gamma, beta, *, eps=_LN_EPS,
                         out_dtype=None, row_block=256):
    N, K = x.shape
    M = w.shape[1]
    out_dtype = x.dtype if out_dtype is None else out_dtype
    TN = min(row_block, _round_up(N, 8))
    Np = _round_up(N, TN)
    if Np != N:
        x = jnp.pad(x, ((0, Np - N), (0, 0)))
        residual = jnp.pad(residual, ((0, Np - N), (0, 0)))
    out = pl.pallas_call(
        functools.partial(_linear_res_ln_kernel, eps=eps),
        out_shape=jax.ShapeDtypeStruct((Np, M), out_dtype),
        grid_spec=pltpu.PrefetchScalarGridSpec(
            num_scalar_prefetch=0,
            grid=(Np // TN,),
            in_specs=[
                pl.BlockSpec((TN, K), lambda i: (i, 0)),
                pl.BlockSpec((K, M), lambda i: (0, 0)),
                pl.BlockSpec((1, M), lambda i: (0, 0)),
                pl.BlockSpec((TN, M), lambda i: (i, 0)),   # residual
                pl.BlockSpec((1, M), lambda i: (0, 0)),
                pl.BlockSpec((1, M), lambda i: (0, 0)),
            ],
            out_specs=pl.BlockSpec((TN, M), lambda i: (i, 0)),
        ),
        compiler_params=pltpu.CompilerParams(dimension_semantics=("parallel",)),
    )(x, w, b.reshape(1, M), residual, gamma.reshape(1, M), beta.reshape(1, M))
    return out[:N] if Np != N else out


# ----------------------------------------------------------------------------
# Kernel 4: masked self-attention; heads packed per grid step (lane-dense blocks),
# q/k/v sliced straight out of the fused QKV tensor via BlockSpec (no transposes).
# ----------------------------------------------------------------------------
def _attention_kernel(q_ref, k_ref, v_ref, mask_ref, out_ref, *, scale, head_dim):
    mask = mask_ref[0]                                         # (1, S) additive f32
    q = q_ref[0]                                               # (S, pack*dh) bf16
    k = k_ref[0]
    v = v_ref[0]
    pack = q.shape[-1] // head_dim
    outs = []
    for h in range(pack):                                      # static unrolled head loop
        sl = slice(h * head_dim, (h + 1) * head_dim)
        s = lax.dot_general(q[:, sl], k[:, sl], (((1,), (1,)), ((), ())),
                            preferred_element_type=jnp.float32) * scale   # (S, S)
        s = s + mask
        m = jnp.max(s, axis=-1, keepdims=True)
        p = jnp.exp(s - m)
        inv = pl.reciprocal(jnp.sum(p, axis=-1, keepdims=True), approx=True)
        p = (p * inv).astype(v.dtype)
        outs.append(jnp.dot(p, v[:, sl], preferred_element_type=jnp.float32))
    out_ref[0] = jnp.concatenate(outs, axis=-1).astype(out_ref.dtype)


def attention_pallas(qkv, add_mask, num_heads):
    """qkv: (B,S,3H) fused projections; add_mask: (B,1,S) additive -> (B,S,H)."""
    B, S, H3 = qkv.shape
    H = H3 // 3
    dh = H // num_heads
    pack = min(num_heads, max(1, 128 // dh))                   # lane-dense (>=128) output blocks
    while num_heads % pack != 0:
        pack -= 1
    G = num_heads // pack
    blk = pack * dh

    return pl.pallas_call(
        functools.partial(_attention_kernel, scale=1.0 / math.sqrt(dh), head_dim=dh),
        out_shape=jax.ShapeDtypeStruct((B, S, H), qkv.dtype),
        grid_spec=pltpu.PrefetchScalarGridSpec(
            num_scalar_prefetch=0,
            grid=(B, G),
            in_specs=[
                pl.BlockSpec((1, S, blk), lambda b, g: (b, 0, g)),          # Q slice
                pl.BlockSpec((1, S, blk), lambda b, g: (b, 0, G + g)),      # K slice
                pl.BlockSpec((1, S, blk), lambda b, g: (b, 0, 2 * G + g)),  # V slice
                pl.BlockSpec((1, 1, S), lambda b, g: (b, 0, 0)),            # additive mask
            ],
            out_specs=pl.BlockSpec((1, S, blk), lambda b, g: (b, 0, g)),
        ),
        compiler_params=pltpu.CompilerParams(dimension_semantics=("parallel", "parallel")),
    )(qkv, qkv, qkv, add_mask)


# ----------------------------------------------------------------------------
# Model forward (BertEmbedding.forward, post-tokenizer)
# ----------------------------------------------------------------------------
def encoder_layer_pallas(p, h, add_mask, num_heads):
    B, S, H = h.shape
    x2 = h.reshape(B * S, H)                                             # bf16
    qkv = linear_pallas(x2, p["wqkv"], p["bqkv"]).reshape(B, S, 3 * H)   # fused QKV
    ctx = attention_pallas(qkv, add_mask, num_heads)                     # (B,S,H) bf16
    h1 = linear_res_ln_pallas(ctx.reshape(B * S, H), p["wo"], p["bo"], x2,
                              p["ln1_g"], p["ln1_b"])
    inter = linear_pallas(h1, p["wi"], p["bi"], activation="gelu")
    h2 = linear_res_ln_pallas(inter, p["wo2"], p["bo2"], h1, p["ln2_g"], p["ln2_b"])
    return h2.reshape(B, S, H)


def bert_embedding_forward(params, token_ids, *, pad_token_id, num_heads):
    """Matches BertEmbedding.forward: returns (out, padding_mask)."""
    B, S = token_ids.shape
    # generate_padding_mask: additive mask, 0 for real tokens, -1e4 at padding (extended (B,1,1,S)).
    pad = (token_ids == pad_token_id).astype(jnp.float32)
    padding_mask = (pad * -10000.0)[:, None, None, :]                    # (B,1,1,S)

    h = bert_embeddings_pallas(token_ids, params["word_emb"], params["pos_emb"],
                               params["type_emb"], params["emb_ln_g"], params["emb_ln_b"])
    add_mask = padding_mask[:, 0]                                        # (B,1,S)
    for lp in params["layers"]:
        h = encoder_layer_pallas(lp, h, add_mask, num_heads)

    H = h.shape[-1]
    out = linear_pallas(h.reshape(B * S, H), params["proj_w"], params["proj_b"],
                        activation="gelu", out_dtype=jnp.float32).reshape(B, S, -1)
    # TODO(synk): nn.Dropout is identity at inference; not applied.
    return out, padding_mask


# ----------------------------------------------------------------------------
# Pure-JAX reference (mirrors the kernel path's bf16 rounding points)
# ----------------------------------------------------------------------------
def _bf(x):
    return x.astype(jnp.bfloat16).astype(jnp.float32)


def _ref_ln(x, g, b, eps=_LN_EPS):
    mean = jnp.mean(x, axis=-1, keepdims=True)
    var = jnp.mean(jnp.square(x - mean), axis=-1, keepdims=True)
    return (x - mean) * lax.rsqrt(var + eps) * g + b


def reference_forward(params, token_ids, *, pad_token_id, num_heads):
    B, S = token_ids.shape
    f32 = jnp.float32
    x = (params["word_emb"][token_ids] + params["pos_emb"][:S][None]
         + params["type_emb"][:1][None])
    h = _bf(_ref_ln(x, params["emb_ln_g"], params["emb_ln_b"]))
    add_mask = ((token_ids == pad_token_id).astype(f32) * -10000.0)[:, None, None, :]
    for p in params["layers"]:
        H = h.shape[-1]
        dh = H // num_heads
        qkv = _bf(jnp.dot(h, p["wqkv"].astype(f32)) + p["bqkv"])
        q, k, v = qkv[..., :H], qkv[..., H:2 * H], qkv[..., 2 * H:]

        def split(t):
            return t.reshape(B, S, num_heads, dh).transpose(0, 2, 1, 3)
        s = jnp.einsum("bhqd,bhkd->bhqk", split(q), split(k)) / math.sqrt(dh)
        s = s + add_mask
        attn = _bf(jax.nn.softmax(s, axis=-1))
        ctx = jnp.einsum("bhqk,bhkd->bhqd", attn, split(v))
        ctx = _bf(ctx.transpose(0, 2, 1, 3).reshape(B, S, H))
        h1 = _bf(_ref_ln(jnp.dot(ctx, p["wo"].astype(f32)) + p["bo"] + h,
                         p["ln1_g"], p["ln1_b"]))
        inter = _bf(_gelu_tanh(jnp.dot(h1, p["wi"].astype(f32)) + p["bi"]))
        h = _bf(_ref_ln(jnp.dot(inter, p["wo2"].astype(f32)) + p["bo2"] + h1,
                        p["ln2_g"], p["ln2_b"]))
    out = _gelu_tanh(jnp.dot(h, params["proj_w"].astype(f32)) + params["proj_b"])
    return out, add_mask


# ----------------------------------------------------------------------------
# Parameter init & demo
# ----------------------------------------------------------------------------
def init_params(key, *, vocab, hidden, inter, n_layers, n_heads, d_model, max_pos):
    del n_heads
    keys = iter(jax.random.split(key, 16 + 16 * n_layers))
    bf = jnp.bfloat16

    def nrm(shape, scale=0.02, dtype=jnp.float32):
        return (scale * jax.random.normal(next(keys), shape, jnp.float32)).astype(dtype)

    params = {
        # Embedding tables stay f32: the DMA row gather is exact regardless of width.
        "word_emb": nrm((vocab, hidden)),
        "pos_emb": nrm((max_pos, hidden)),
        "type_emb": nrm((2, hidden)),
        "emb_ln_g": 1.0 + nrm((hidden,), 0.05),
        "emb_ln_b": nrm((hidden,)),
        # Encoder / projection weights bf16 (MXU native); biases & LN params f32.
        "proj_w": nrm((hidden, d_model), dtype=bf),
        "proj_b": nrm((d_model,)),
        "layers": [],
    }
    for _ in range(n_layers):
        params["layers"].append({
            "wqkv": nrm((hidden, 3 * hidden), dtype=bf), "bqkv": nrm((3 * hidden,)),
            "wo": nrm((hidden, hidden), dtype=bf), "bo": nrm((hidden,)),
            "ln1_g": 1.0 + nrm((hidden,), 0.05), "ln1_b": nrm((hidden,)),
            "wi": nrm((hidden, inter), dtype=bf), "bi": nrm((inter,)),
            "wo2": nrm((inter, hidden), dtype=bf), "bo2": nrm((hidden,)),
            "ln2_g": 1.0 + nrm((hidden,), 0.05), "ln2_b": nrm((hidden,)),
        })
    return params


if __name__ == "__main__":
    B, S = 2, 8
    HIDDEN = 128          # config.HIDDEN_SIZE (lane-dense: multiple of 128)
    D_MODEL = 128         # config.D_MODEL
    N_LAYERS = 2          # config.NUM_HIDDEN_LAYERS
    N_HEADS = 2           # config.NUM_ATTENTION_HEADS
    INTER = 4 * HIDDEN
    VOCAB = 256
    MAX_POS = 64
    PAD_ID = 0            # tokenizer.pad_token_id

    key = jax.random.PRNGKey(0)
    k_par, k_tok = jax.random.split(key)
    params = init_params(k_par, vocab=VOCAB, hidden=HIDDEN, inter=INTER, n_layers=N_LAYERS,
                         n_heads=N_HEADS, d_model=D_MODEL, max_pos=MAX_POS)

    # TODO(synk): tokenizer(questions) is string processing; deterministic token ids used instead.
    token_ids = jax.random.randint(k_tok, (B, S), 1, VOCAB, dtype=jnp.int32)
    token_ids = token_ids.at[0, -2:].set(PAD_ID).at[1, -3:].set(PAD_ID)

    out, padding_mask = bert_embedding_forward(params, token_ids,
                                               pad_token_id=PAD_ID, num_heads=N_HEADS)
    jax.block_until_ready(out)
    jax.block_until_ready(padding_mask)

    out_ref, mask_ref = reference_forward(params, token_ids,
                                          pad_token_id=PAD_ID, num_heads=N_HEADS)

    # Embedding kernel (DMA row gather) checked on its own as well.
    emb = bert_embeddings_pallas(token_ids, params["word_emb"], params["pos_emb"],
                                 params["type_emb"], params["emb_ln_g"], params["emb_ln_b"])
    emb_ref = _ref_ln(params["word_emb"][token_ids] + params["pos_emb"][:S][None]
                      + params["type_emb"][:1][None], params["emb_ln_g"], params["emb_ln_b"])

    assert out.shape == (B, S, D_MODEL) and out.dtype == jnp.float32
    assert padding_mask.shape == (B, 1, 1, S) and padding_mask.dtype == jnp.float32
    assert bool(jnp.all(padding_mask == mask_ref))
    # Tolerance covers bf16 activation rounding + approx-reciprocal softmax normalization.
    assert jnp.allclose(emb.astype(jnp.float32), emb_ref, atol=2e-2, rtol=2e-2)
    assert jnp.allclose(out, out_ref, atol=2e-2, rtol=2e-2)

    print("KERNEL_OK")
</pallas_src>

<mosaic_0001>
module attributes {stable_mosaic.version = 11 : i64} {
  func.func @_bert_embeddings_kernel(%arg0: i32, %arg1: memref<2x8xi32, #tpu.memory_space<smem>>, %arg2: memref<8x128xf32, #tpu.memory_space<vmem>>, %arg3: memref<1x128xf32, #tpu.memory_space<vmem>>, %arg4: memref<1x128xf32, #tpu.memory_space<vmem>>, %arg5: memref<1x128xf32, #tpu.memory_space<vmem>>, %arg6: memref<256x128xf32, #tpu.memory_space<any>>, %arg7: memref<1x8x128xbf16, #tpu.memory_space<vmem>>, %arg8: memref<8x128xf32, #tpu.memory_space<vmem>>, %arg9: memref<8x!tpu.dma_semaphore, #tpu.memory_space<semaphore_mem>>) attributes {dimension_semantics = [#tpu.dimension_semantics<parallel>], iteration_bounds = array<i64: 2>, scalar_prefetch = 1 : i64, scratch_operands = 2 : i64, tpu.core_type = #tpu.core_type<tc>, window_params = [{pipeline_mode = #tpu.pipeline_mode<synchronous>, transform_indices = @transform_0, window_bounds = array<i64: 8, 128>}, {pipeline_mode = #tpu.pipeline_mode<synchronous>, transform_indices = @transform_1, window_bounds = array<i64: 1, 128>}, {pipeline_mode = #tpu.pipeline_mode<synchronous>, transform_indices = @transform_2, window_bounds = array<i64: 1, 128>}, {pipeline_mode = #tpu.pipeline_mode<synchronous>, transform_indices = @transform_3, window_bounds = array<i64: 1, 128>}, {}, {transform_indices = @transform_5, window_bounds = array<i64: 1, 8, 128>}]} {
    %c0_i32 = arith.constant 0 : i32
    %c1_i32 = arith.constant 1 : i32
    %0 = arith.muli %c0_i32, %c1_i32 : i32
    %c0_i32_0 = arith.constant 0 : i32
    %1 = arith.addi %c0_i32_0, %0 : i32
    %2 = arith.index_cast %arg0 : i32 to index
    %3 = arith.index_cast %1 : i32 to index
    %4 = memref.load %arg1[%2, %3] : memref<2x8xi32, #tpu.memory_space<smem>>
    %c0_i32_1 = arith.constant 0 : i32
    %5 = tpu.memref_slice %arg6[%4, %c0_i32_1] : memref<256x128xf32, #tpu.memory_space<any>> -> memref<1x128xf32, #tpu.memory_space<any>>
    %c0_i32_2 = arith.constant 0 : i32
    %6 = tpu.memref_slice %arg8[%1, %c0_i32_2] : memref<8x128xf32, #tpu.memory_space<vmem>> -> memref<1x128xf32, #tpu.memory_space<vmem>>
    %7 = tpu.memref_slice %arg9[%1] : memref<8x!tpu.dma_semaphore, #tpu.memory_space<semaphore_mem>> -> memref<1x!tpu.dma_semaphore, #tpu.memory_space<semaphore_mem>>
    %8 = tpu.memref_squeeze %7 : memref<1x!tpu.dma_semaphore, #tpu.memory_space<semaphore_mem>> -> memref<!tpu.dma_semaphore, #tpu.memory_space<semaphore_mem>>
    tpu.enqueue_dma source(%5 : memref<1x128xf32, #tpu.memory_space<any>>) target(%6 : memref<1x128xf32, #tpu.memory_space<vmem>>) target_semaphore(%8 : memref<!tpu.dma_semaphore, #tpu.memory_space<semaphore_mem>>)
    %c1_i32_3 = arith.constant 1 : i32
    %c1_i32_4 = arith.constant 1 : i32
    %9 = arith.muli %c1_i32_3, %c1_i32_4 : i32
    %c0_i32_5 = arith.constant 0 : i32
    %10 = arith.addi %c0_i32_5, %9 : i32
    %11 = arith.index_cast %arg0 : i32 to index
    %12 = arith.index_cast %10 : i32 to index
    %13 = memref.load %arg1[%11, %12] : memref<2x8xi32, #tpu.memory_space<smem>>
    %c0_i32_6 = arith.constant 0 : i32
    %14 = tpu.memref_slice %arg6[%13, %c0_i32_6] : memref<256x128xf32, #tpu.memory_space<any>> -> memref<1x128xf32, #tpu.memory_space<any>>
    %c0_i32_7 = arith.constant 0 : i32
    %15 = tpu.memref_slice %arg8[%10, %c0_i32_7] : memref<8x128xf32, #tpu.memory_space<vmem>> -> memref<1x128xf32, #tpu.memory_space<vmem>>
    %16 = tpu.memref_slice %arg9[%10] : memref<8x!tpu.dma_semaphore, #tpu.memory_space<semaphore_mem>> -> memref<1x!tpu.dma_semaphore, #tpu.memory_space<semaphore_mem>>
    %17 = tpu.memref_squeeze %16 : memref<1x!tpu.dma_semaphore, #tpu.memory_space<semaphore_mem>> -> memref<!tpu.dma_semaphore, #tpu.memory_space<semaphore_mem>>
    tpu.enqueue_dma source(%14 : memref<1x128xf32, #tpu.memory_space<any>>) target(%15 : memref<1x128xf32, #tpu.memory_space<vmem>>) target_semaphore(%17 : memref<!tpu.dma_semaphore, #tpu.memory_space<semaphore_mem>>)
    %c2_i32 = arith.constant 2 : i32
    %c1_i32_8 = arith.constant 1 : i32
    %18 = arith.muli %c2_i32, %c1_i32_8 : i32
    %c0_i32_9 = arith.constant 0 : i32
    %19 = arith.addi %c0_i32_9, %18 : i32
    %20 = arith.index_cast %arg0 : i32 to index
    %21 = arith.index_cast %19 : i32 to index
    %22 = memref.load %arg1[%20, %21] : memref<2x8xi32, #tpu.memory_space<smem>>
    %c0_i32_10 = arith.constant 0 : i32
    %23 = tpu.memref_slice %arg6[%22, %c0_i32_10] : memref<256x128xf32, #tpu.memory_space<any>> -> memref<1x128xf32, #tpu.memory_space<any>>
    %c0_i32_11 = arith.constant 0 : i32
    %24 = tpu.memref_slice %arg8[%19, %c0_i32_11] : memref<8x128xf32, #tpu.memory_space<vmem>> -> memref<1x128xf32, #tpu.memory_space<vmem>>
    %25 = tpu.memref_slice %arg9[%19] : memref<8x!tpu.dma_semaphore, #tpu.memory_space<semaphore_mem>> -> memref<1x!tpu.dma_semaphore, #tpu.memory_space<semaphore_mem>>
    %26 = tpu.memref_squeeze %25 : memref<1x!tpu.dma_semaphore, #tpu.memory_space<semaphore_mem>> -> memref<!tpu.dma_semaphore, #tpu.memory_space<semaphore_mem>>
    tpu.enqueue_dma source(%23 : memref<1x128xf32, #tpu.memory_space<any>>) target(%24 : memref<1x128xf32, #tpu.memory_space<vmem>>) target_semaphore(%26 : memref<!tpu.dma_semaphore, #tpu.memory_space<semaphore_mem>>)
    %c3_i32 = arith.constant 3 : i32
    %c1_i32_12 = arith.constant 1 : i32
    %27 = arith.muli %c3_i32, %c1_i32_12 : i32
    %c0_i32_13 = arith.constant 0 : i32
    %28 = arith.addi %c0_i32_13, %27 : i32
    %29 = arith.index_cast %arg0 : i32 to index
    %30 = arith.index_cast %28 : i32 to index
    %31 = memref.load %arg1[%29, %30] : memref<2x8xi32, #tpu.memory_space<smem>>
    %c0_i32_14 = arith.constant 0 : i32
    %32 = tpu.memref_slice %arg6[%31, %c0_i32_14] : memref<256x128xf32, #tpu.memory_space<any>> -> memref<1x128xf32, #tpu.memory_space<any>>
    %c0_i32_15 = arith.constant 0 : i32
    %33 = tpu.memref_slice %arg8[%28, %c0_i32_15] : memref<8x128xf32, #tpu.memory_space<vmem>> -> memref<1x128xf32, #tpu.memory_space<vmem>>
    %34 = tpu.memref_slice %arg9[%28] : memref<8x!tpu.dma_semaphore, #tpu.memory_space<semaphore_mem>> -> memref<1x!tpu.dma_semaphore, #tpu.memory_space<semaphore_mem>>
    %35 = tpu.memref_squeeze %34 : memref<1x!tpu.dma_semaphore, #tpu.memory_space<semaphore_mem>> -> memref<!tpu.dma_semaphore, #tpu.memory_space<semaphore_mem>>
    tpu.enqueue_dma source(%32 : memref<1x128xf32, #tpu.memory_space<any>>) target(%33 : memref<1x128xf32, #tpu.memory_space<vmem>>) target_semaphore(%35 : memref<!tpu.dma_semaphore, #tpu.memory_space<semaphore_mem>>)
    %c4_i32 = arith.constant 4 : i32
    %c1_i32_16 = arith.constant 1 : i32
    %36 = arith.muli %c4_i32, %c1_i32_16 : i32
    %c0_i32_17 = arith.constant 0 : i32
    %37 = arith.addi %c0_i32_17, %36 : i32
    %38 = arith.index_cast %arg0 : i32 to index
    %39 = arith.index_cast %37 : i32 to index
    %40 = memref.load %arg1[%38, %39] : memref<2x8xi32, #tpu.memory_space<smem>>
    %c0_i32_18 = arith.constant 0 : i32
    %41 = tpu.memref_slice %arg6[%40, %c0_i32_18] : memref<256x128xf32, #tpu.memory_space<any>> -> memref<1x128xf32, #tpu.memory_space<any>>
    %c0_i32_19 = arith.constant 0 : i32
    %42 = tpu.memref_slice %arg8[%37, %c0_i32_19] : memref<8x128xf32, #tpu.memory_space<vmem>> -> memref<1x128xf32, #tpu.memory_space<vmem>>
    %43 = tpu.memref_slice %arg9[%37] : memref<8x!tpu.dma_semaphore, #tpu.memory_space<semaphore_mem>> -> memref<1x!tpu.dma_semaphore, #tpu.memory_space<semaphore_mem>>
    %44 = tpu.memref_squeeze %43 : memref<1x!tpu.dma_semaphore, #tpu.memory_space<semaphore_mem>> -> memref<!tpu.dma_semaphore, #tpu.memory_space<semaphore_mem>>
    tpu.enqueue_dma source(%41 : memref<1x128xf32, #tpu.memory_space<any>>) target(%42 : memref<1x128xf32, #tpu.memory_space<vmem>>) target_semaphore(%44 : memref<!tpu.dma_semaphore, #tpu.memory_space<semaphore_mem>>)
    %c5_i32 = arith.constant 5 : i32
    %c1_i32_20 = arith.constant 1 : i32
    %45 = arith.muli %c5_i32, %c1_i32_20 : i32
    %c0_i32_21 = arith.constant 0 : i32
    %46 = arith.addi %c0_i32_21, %45 : i32
    %47 = arith.index_cast %arg0 : i32 to index
    %48 = arith.index_cast %46 : i32 to index
    %49 = memref.load %arg1[%47, %48] : memref<2x8xi32, #tpu.memory_space<smem>>
    %c0_i32_22 = arith.constant 0 : i32
    %50 = tpu.memref_slice %arg6[%49, %c0_i32_22] : memref<256x128xf32, #tpu.memory_space<any>> -> memref<1x128xf32, #tpu.memory_space<any>>
    %c0_i32_23 = arith.constant 0 : i32
    %51 = tpu.memref_slice %arg8[%46, %c0_i32_23] : memref<8x128xf32, #tpu.memory_space<vmem>> -> memref<1x128xf32, #tpu.memory_space<vmem>>
    %52 = tpu.memref_slice %arg9[%46] : memref<8x!tpu.dma_semaphore, #tpu.memory_space<semaphore_mem>> -> memref<1x!tpu.dma_semaphore, #tpu.memory_space<semaphore_mem>>
    %53 = tpu.memref_squeeze %52 : memref<1x!tpu.dma_semaphore, #tpu.memory_space<semaphore_mem>> -> memref<!tpu.dma_semaphore, #tpu.memory_space<semaphore_mem>>
    tpu.enqueue_dma source(%50 : memref<1x128xf32, #tpu.memory_space<any>>) target(%51 : memref<1x128xf32, #tpu.memory_space<vmem>>) target_semaphore(%53 : memref<!tpu.dma_semaphore, #tpu.memory_space<semaphore_mem>>)
    %c6_i32 = arith.constant 6 : i32
    %c1_i32_24 = arith.constant 1 : i32
    %54 = arith.muli %c6_i32, %c1_i32_24 : i32
    %c0_i32_25 = arith.constant 0 : i32
    %55 = arith.addi %c0_i32_25, %54 : i32
    %56 = arith.index_cast %arg0 : i32 to index
    %57 = arith.index_cast %55 : i32 to index
    %58 = memref.load %arg1[%56, %57] : memref<2x8xi32, #tpu.memory_space<smem>>
    %c0_i32_26 = arith.constant 0 : i32
    %59 = tpu.memref_slice %arg6[%58, %c0_i32_26] : memref<256x128xf32, #tpu.memory_space<any>> -> memref<1x128xf32, #tpu.memory_space<any>>
    %c0_i32_27 = arith.constant 0 : i32
    %60 = tpu.memref_slice %arg8[%55, %c0_i32_27] : memref<8x128xf32, #tpu.memory_space<vmem>> -> memref<1x128xf32, #tpu.memory_space<vmem>>
    %61 = tpu.memref_slice %arg9[%55] : memref<8x!tpu.dma_semaphore, #tpu.memory_space<semaphore_mem>> -> memref<1x!tpu.dma_semaphore, #tpu.memory_space<semaphore_mem>>
    %62 = tpu.memref_squeeze %61 : memref<1x!tpu.dma_semaphore, #tpu.memory_space<semaphore_mem>> -> memref<!tpu.dma_semaphore, #tpu.memory_space<semaphore_mem>>
    tpu.enqueue_dma source(%59 : memref<1x128xf32, #tpu.memory_space<any>>) target(%60 : memref<1x128xf32, #tpu.memory_space<vmem>>) target_semaphore(%62 : memref<!tpu.dma_semaphore, #tpu.memory_space<semaphore_mem>>)
    %c7_i32 = arith.constant 7 : i32
    %c1_i32_28 = arith.constant 1 : i32
    %63 = arith.muli %c7_i32, %c1_i32_28 : i32
    %c0_i32_29 = arith.constant 0 : i32
    %64 = arith.addi %c0_i32_29, %63 : i32
    %65 = arith.index_cast %arg0 : i32 to index
    %66 = arith.index_cast %64 : i32 to index
    %67 = memref.load %arg1[%65, %66] : memref<2x8xi32, #tpu.memory_space<smem>>
    %c0_i32_30 = arith.constant 0 : i32
    %68 = tpu.memref_slice %arg6[%67, %c0_i32_30] : memref<256x128xf32, #tpu.memory_space<any>> -> memref<1x128xf32, #tpu.memory_space<any>>
    %c0_i32_31 = arith.constant 0 : i32
    %69 = tpu.memref_slice %arg8[%64, %c0_i32_31] : memref<8x128xf32, #tpu.memory_space<vmem>> -> memref<1x128xf32, #tpu.memory_space<vmem>>
    %70 = tpu.memref_slice %arg9[%64] : memref<8x!tpu.dma_semaphore, #tpu.memory_space<semaphore_mem>> -> memref<1x!tpu.dma_semaphore, #tpu.memory_space<semaphore_mem>>
    %71 = tpu.memref_squeeze %70 : memref<1x!tpu.dma_semaphore, #tpu.memory_space<semaphore_mem>> -> memref<!tpu.dma_semaphore, #tpu.memory_space<semaphore_mem>>
    tpu.enqueue_dma source(%68 : memref<1x128xf32, #tpu.memory_space<any>>) target(%69 : memref<1x128xf32, #tpu.memory_space<vmem>>) target_semaphore(%71 : memref<!tpu.dma_semaphore, #tpu.memory_space<semaphore_mem>>)
    %c8_i32 = arith.constant 8 : i32
    %c0_i32_32 = arith.constant 0 : i32
    %c1_i32_33 = arith.constant 1 : i32
    %72 = arith.muli %c0_i32_32, %c1_i32_33 : i32
    %c0_i32_34 = arith.constant 0 : i32
    %73 = arith.addi %c0_i32_34, %72 : i32
    %c0_i32_35 = arith.constant 0 : i32
    %c0_i32_36 = arith.constant 0 : i32
    %74 = tpu.memref_slice %arg6[%c0_i32_35, %c0_i32_36] : memref<256x128xf32, #tpu.memory_space<any>> -> memref<1x128xf32, #tpu.memory_space<any>>
    %c0_i32_37 = arith.constant 0 : i32
    %75 = tpu.memref_slice %arg8[%73, %c0_i32_37] : memref<8x128xf32, #tpu.memory_space<vmem>> -> memref<1x128xf32, #tpu.memory_space<vmem>>
    %76 = tpu.memref_slice %arg9[%73] : memref<8x!tpu.dma_semaphore, #tpu.memory_space<semaphore_mem>> -> memref<1x!tpu.dma_semaphore, #tpu.memory_space<semaphore_mem>>
    %77 = tpu.memref_squeeze %76 : memref<1x!tpu.dma_semaphore, #tpu.memory_space<semaphore_mem>> -> memref<!tpu.dma_semaphore, #tpu.memory_space<semaphore_mem>>
    tpu.wait_dma2 semaphore(%77 : memref<!tpu.dma_semaphore, #tpu.memory_space<semaphore_mem>>) src(%74 : memref<1x128xf32, #tpu.memory_space<any>>) dst(%75 : memref<1x128xf32, #tpu.memory_space<vmem>>)
    %c1_i32_38 = arith.constant 1 : i32
    %c1_i32_39 = arith.constant 1 : i32
    %78 = arith.muli %c1_i32_38, %c1_i32_39 : i32
    %c0_i32_40 = arith.constant 0 : i32
    %79 = arith.addi %c0_i32_40, %78 : i32
    %c0_i32_41 = arith.constant 0 : i32
    %c0_i32_42 = arith.constant 0 : i32
    %80 = tpu.memref_slice %arg6[%c0_i32_41, %c0_i32_42] : memref<256x128xf32, #tpu.memory_space<any>> -> memref<1x128xf32, #tpu.memory_space<any>>
    %c0_i32_43 = arith.constant 0 : i32
    %81 = tpu.memref_slice %arg8[%79, %c0_i32_43] : memref<8x128xf32, #tpu.memory_space<vmem>> -> memref<1x128xf32, #tpu.memory_space<vmem>>
    %82 = tpu.memref_slice %arg9[%79] : memref<8x!tpu.dma_semaphore, #tpu.memory_space<semaphore_mem>> -> memref<1x!tpu.dma_semaphore, #tpu.memory_space<semaphore_mem>>
    %83 = tpu.memref_squeeze %82 : memref<1x!tpu.dma_semaphore, #tpu.memory_space<semaphore_mem>> -> memref<!tpu.dma_semaphore, #tpu.memory_space<semaphore_mem>>
    tpu.wait_dma2 semaphore(%83 : memref<!tpu.dma_semaphore, #tpu.memory_space<semaphore_mem>>) src(%80 : memref<1x128xf32, #tpu.memory_space<any>>) dst(%81 : memref<1x128xf32, #tpu.memory_space<vmem>>)
    %c2_i32_44 = arith.constant 2 : i32
    %c1_i32_45 = arith.constant 1 : i32
    %84 = arith.muli %c2_i32_44, %c1_i32_45 : i32
    %c0_i32_46 = arith.constant 0 : i32
    %85 = arith.addi %c0_i32_46, %84 : i32
    %c0_i32_47 = arith.constant 0 : i32
    %c0_i32_48 = arith.constant 0 : i32
    %86 = tpu.memref_slice %arg6[%c0_i32_47, %c0_i32_48] : memref<256x128xf32, #tpu.memory_space<any>> -> memref<1x128xf32, #tpu.memory_space<any>>
    %c0_i32_49 = arith.constant 0 : i32
    %87 = tpu.memref_slice %arg8[%85, %c0_i32_49] : memref<8x128xf32, #tpu.memory_space<vmem>> -> memref<1x128xf32, #tpu.memory_space<vmem>>
    %88 = tpu.memref_slice %arg9[%85] : memref<8x!tpu.dma_semaphore, #tpu.memory_space<semaphore_mem>> -> memref<1x!tpu.dma_semaphore, #tpu.memory_space<semaphore_mem>>
    %89 = tpu.memref_squeeze %88 : memref<1x!tpu.dma_semaphore, #tpu.memory_space<semaphore_mem>> -> memref<!tpu.dma_semaphore, #tpu.memory_space<semaphore_mem>>
    tpu.wait_dma2 semaphore(%89 : memref<!tpu.dma_semaphore, #tpu.memory_space<semaphore_mem>>) src(%86 : memref<1x128xf32, #tpu.memory_space<any>>) dst(%87 : memref<1x128xf32, #tpu.memory_space<vmem>>)
    %c3_i32_50 = arith.constant 3 : i32
    %c1_i32_51 = arith.constant 1 : i32
    %90 = arith.muli %c3_i32_50, %c1_i32_51 : i32
    %c0_i32_52 = arith.constant 0 : i32
    %91 = arith.addi %c0_i32_52, %90 : i32
    %c0_i32_53 = arith.constant 0 : i32
    %c0_i32_54 = arith.constant 0 : i32
    %92 = tpu.memref_slice %arg6[%c0_i32_53, %c0_i32_54] : memref<256x128xf32, #tpu.memory_space<any>> -> memref<1x128xf32, #tpu.memory_space<any>>
    %c0_i32_55 = arith.constant 0 : i32
    %93 = tpu.memref_slice %arg8[%91, %c0_i32_55] : memref<8x128xf32, #tpu.memory_space<vmem>> -> memref<1x128xf32, #tpu.memory_space<vmem>>
    %94 = tpu.memref_slice %arg9[%91] : memref<8x!tpu.dma_semaphore, #tpu.memory_space<semaphore_mem>> -> memref<1x!tpu.dma_semaphore, #tpu.memory_space<semaphore_mem>>
    %95 = tpu.memref_squeeze %94 : memref<1x!tpu.dma_semaphore, #tpu.memory_space<semaphore_mem>> -> memref<!tpu.dma_semaphore, #tpu.memory_space<semaphore_mem>>
    tpu.wait_dma2 semaphore(%95 : memref<!tpu.dma_semaphore, #tpu.memory_space<semaphore_mem>>) src(%92 : memref<1x128xf32, #tpu.memory_space<any>>) dst(%93 : memref<1x128xf32, #tpu.memory_space<vmem>>)
    %c4_i32_56 = arith.constant 4 : i32
    %c1_i32_57 = arith.constant 1 : i32
    %96 = arith.muli %c4_i32_56, %c1_i32_57 : i32
    %c0_i32_58 = arith.constant 0 : i32
    %97 = arith.addi %c0_i32_58, %96 : i32
    %c0_i32_59 = arith.constant 0 : i32
    %c0_i32_60 = arith.constant 0 : i32
    %98 = tpu.memref_slice %arg6[%c0_i32_59, %c0_i32_60] : memref<256x128xf32, #tpu.memory_space<any>> -> memref<1x128xf32, #tpu.memory_space<any>>
    %c0_i32_61 = arith.constant 0 : i32
    %99 = tpu.memref_slice %arg8[%97, %c0_i32_61] : memref<8x128xf32, #tpu.memory_space<vmem>> -> memref<1x128xf32, #tpu.memory_space<vmem>>
    %100 = tpu.memref_slice %arg9[%97] : memref<8x!tpu.dma_semaphore, #tpu.memory_space<semaphore_mem>> -> memref<1x!tpu.dma_semaphore, #tpu.memory_space<semaphore_mem>>
    %101 = tpu.memref_squeeze %100 : memref<1x!tpu.dma_semaphore, #tpu.memory_space<semaphore_mem>> -> memref<!tpu.dma_semaphore, #tpu.memory_space<semaphore_mem>>
    tpu.wait_dma2 semaphore(%101 : memref<!tpu.dma_semaphore, #tpu.memory_space<semaphore_mem>>) src(%98 : memref<1x128xf32, #tpu.memory_space<any>>) dst(%99 : memref<1x128xf32, #tpu.memory_space<vmem>>)
    %c5_i32_62 = arith.constant 5 : i32
    %c1_i32_63 = arith.constant 1 : i32
    %102 = arith.muli %c5_i32_62, %c1_i32_63 : i32
    %c0_i32_64 = arith.constant 0 : i32
    %103 = arith.addi %c0_i32_64, %102 : i32
    %c0_i32_65 = arith.constant 0 : i32
    %c0_i32_66 = arith.constant 0 : i32
    %104 = tpu.memref_slice %arg6[%c0_i32_65, %c0_i32_66] : memref<256x128xf32, #tpu.memory_space<any>> -> memref<1x128xf32, #tpu.memory_space<any>>
    %c0_i32_67 = arith.constant 0 : i32
    %105 = tpu.memref_slice %arg8[%103, %c0_i32_67] : memref<8x128xf32, #tpu.memory_space<vmem>> -> memref<1x128xf32, #tpu.memory_space<vmem>>
    %106 = tpu.memref_slice %arg9[%103] : memref<8x!tpu.dma_semaphore, #tpu.memory_space<semaphore_mem>> -> memref<1x!tpu.dma_semaphore, #tpu.memory_space<semaphore_mem>>
    %107 = tpu.memref_squeeze %106 : memref<1x!tpu.dma_semaphore, #tpu.memory_space<semaphore_mem>> -> memref<!tpu.dma_semaphore, #tpu.memory_space<semaphore_mem>>
    tpu.wait_dma2 semaphore(%107 : memref<!tpu.dma_semaphore, #tpu.memory_space<semaphore_mem>>) src(%104 : memref<1x128xf32, #tpu.memory_space<any>>) dst(%105 : memref<1x128xf32, #tpu.memory_space<vmem>>)
    %c6_i32_68 = arith.constant 6 : i32
    %c1_i32_69 = arith.constant 1 : i32
    %108 = arith.muli %c6_i32_68, %c1_i32_69 : i32
    %c0_i32_70 = arith.constant 0 : i32
    %109 = arith.addi %c0_i32_70, %108 : i32
    %c0_i32_71 = arith.constant 0 : i32
    %c0_i32_72 = arith.constant 0 : i32
    %110 = tpu.memref_slice %arg6[%c0_i32_71, %c0_i32_72] : memref<256x128xf32, #tpu.memory_space<any>> -> memref<1x128xf32, #tpu.memory_space<any>>
    %c0_i32_73 = arith.constant 0 : i32
    %111 = tpu.memref_slice %arg8[%109, %c0_i32_73] : memref<8x128xf32, #tpu.memory_space<vmem>> -> memref<1x128xf32, #tpu.memory_space<vmem>>
    %112 = tpu.memref_slice %arg9[%109] : memref<8x!tpu.dma_semaphore, #tpu.memory_space<semaphore_mem>> -> memref<1x!tpu.dma_semaphore, #tpu.memory_space<semaphore_mem>>
    %113 = tpu.memref_squeeze %112 : memref<1x!tpu.dma_semaphore, #tpu.memory_space<semaphore_mem>> -> memref<!tpu.dma_semaphore, #tpu.memory_space<semaphore_mem>>
    tpu.wait_dma2 semaphore(%113 : memref<!tpu.dma_semaphore, #tpu.memory_space<semaphore_mem>>) src(%110 : memref<1x128xf32, #tpu.memory_space<any>>) dst(%111 : memref<1x128xf32, #tpu.memory_space<vmem>>)
    %c7_i32_74 = arith.constant 7 : i32
    %c1_i32_75 = arith.constant 1 : i32
    %114 = arith.muli %c7_i32_74, %c1_i32_75 : i32
    %c0_i32_76 = arith.constant 0 : i32
    %115 = arith.addi %c0_i32_76, %114 : i32
    %c0_i32_77 = arith.constant 0 : i32
    %c0_i32_78 = arith.constant 0 : i32
    %116 = tpu.memref_slice %arg6[%c0_i32_77, %c0_i32_78] : memref<256x128xf32, #tpu.memory_space<any>> -> memref<1x128xf32, #tpu.memory_space<any>>
    %c0_i32_79 = arith.constant 0 : i32
    %117 = tpu.memref_slice %arg8[%115, %c0_i32_79] : memref<8x128xf32, #tpu.memory_space<vmem>> -> memref<1x128xf32, #tpu.memory_space<vmem>>
    %118 = tpu.memref_slice %arg9[%115] : memref<8x!tpu.dma_semaphore, #tpu.memory_space<semaphore_mem>> -> memref<1x!tpu.dma_semaphore, #tpu.memory_space<semaphore_mem>>
    %119 = tpu.memref_squeeze %118 : memref<1x!tpu.dma_semaphore, #tpu.memory_space<semaphore_mem>> -> memref<!tpu.dma_semaphore, #tpu.memory_space<semaphore_mem>>
    tpu.wait_dma2 semaphore(%119 : memref<!tpu.dma_semaphore, #tpu.memory_space<semaphore_mem>>) src(%116 : memref<1x128xf32, #tpu.memory_space<any>>) dst(%117 : memref<1x128xf32, #tpu.memory_space<vmem>>)
    %c8_i32_80 = arith.constant 8 : i32
    %c0 = arith.constant 0 : index
    %c0_81 = arith.constant 0 : index
    %120 = vector.load %arg8[%c0, %c0_81] : memref<8x128xf32, #tpu.memory_space<vmem>>, vector<8x128xf32>
    %c0_82 = arith.constant 0 : index
    %c0_83 = arith.constant 0 : index
    %121 = vector.load %arg2[%c0_82, %c0_83] : memref<8x128xf32, #tpu.memory_space<vmem>>, vector<8x128xf32>
    %122 = arith.addf %120, %121 : vector<8x128xf32>
    %c0_84 = arith.constant 0 : index
    %c0_85 = arith.constant 0 : index
    %123 = vector.load %arg3[%c0_84, %c0_85] : memref<1x128xf32, #tpu.memory_space<vmem>>, vector<1x128xf32>
    %124 = vector.broadcast %123 : vector<1x128xf32> to vector<8x128xf32>
    %125 = arith.addf %122, %124 : vector<8x128xf32>
    %cst = arith.constant dense<0.000000e+00> : vector<8xf32>
    %126 = vector.multi_reduction <add>, %125, %cst [1] : vector<8x128xf32> to vector<8xf32>
    %127 = vector.shape_cast %126 : vector<8xf32> to vector<8x1xf32>
    %cst_86 = arith.constant 1.280000e+02 : f32
    %128 = vector.broadcast %cst_86 : f32 to vector<8x1xf32>
    %129 = arith.divf %127, %128 : vector<8x1xf32>
    %130 = vector.broadcast %129 : vector<8x1xf32> to vector<8x128xf32>
    %131 = arith.subf %125, %130 : vector<8x128xf32>
    %132 = arith.mulf %131, %131 : vector<8x128xf32>
    %cst_87 = arith.constant dense<0.000000e+00> : vector<8xf32>
    %133 = vector.multi_reduction <add>, %132, %cst_87 [1] : vector<8x128xf32> to vector<8xf32>
    %134 = vector.shape_cast %133 : vector<8xf32> to vector<8x1xf32>
    %cst_88 = arith.constant 1.280000e+02 : f32
    %135 = vector.broadcast %cst_88 : f32 to vector<8x1xf32>
    %136 = arith.divf %134, %135 : vector<8x1xf32>
    %137 = vector.broadcast %129 : vector<8x1xf32> to vector<8x128xf32>
    %138 = arith.subf %125, %137 : vector<8x128xf32>
    %cst_89 = arith.constant 9.99999996E-13 : f32
    %139 = vector.broadcast %cst_89 : f32 to vector<8x1xf32>
    %140 = arith.addf %136, %139 : vector<8x1xf32>
    %141 = math.rsqrt %140 : vector<8x1xf32>
    %142 = vector.broadcast %141 : vector<8x1xf32> to vector<8x128xf32>
    %143 = arith.mulf %138, %142 : vector<8x128xf32>
    %c0_90 = arith.constant 0 : index
    %c0_91 = arith.constant 0 : index
    %144 = vector.load %arg4[%c0_90, %c0_91] : memref<1x128xf32, #tpu.memory_space<vmem>>, vector<1x128xf32>
    %145 = vector.broadcast %144 : vector<1x128xf32> to vector<8x128xf32>
    %146 = arith.mulf %143, %145 : vector<8x128xf32>
    %c0_92 = arith.constant 0 : index
    %c0_93 = arith.constant 0 : index
    %147 = vector.load %arg5[%c0_92, %c0_93] : memref<1x128xf32, #tpu.memory_space<vmem>>, vector<1x128xf32>
    %148 = vector.broadcast %147 : vector<1x128xf32> to vector<8x128xf32>
    %149 = arith.addf %146, %148 : vector<8x128xf32>
    %150 = arith.truncf %149 : vector<8x128xf32> to vector<8x128xbf16>
    %c0_94 = arith.constant 0 : index
    %c0_95 = arith.constant 0 : index
    %c0_96 = arith.constant 0 : index
    %151 = vector.load %arg7[%c0_94, %c0_95, %c0_96] : memref<1x8x128xbf16, #tpu.memory_space<vmem>>, vector<1x8x128xbf16>
    %152 = vector.shape_cast %151 : vector<1x8x128xbf16> to vector<8x128xbf16>
    %153 = vector.shape_cast %150 : vector<8x128xbf16> to vector<1x8x128xbf16>
    tpu.vector_store %arg7[%c0_94, %c0_95, %c0_96], %153 {strides = array<i32>} : memref<1x8x128xbf16, #tpu.memory_space<vmem>>, vector<1x8x128xbf16>,
    return
  }
  func.func @transform_0(%arg0: i32, %arg1: memref<2x8xi32, #tpu.memory_space<smem>>) -> (i32, i32) {
    %c0_i32 = arith.constant 0 : i32
    %c0_i32_0 = arith.constant 0 : i32
    %c0_i32_1 = arith.constant 0 : i32
    return %c0_i32, %c0_i32_0 : i32, i32
  }
  func.func @transform_1(%arg0: i32, %arg1: memref<2x8xi32, #tpu.memory_space<smem>>) -> (i32, i32) {
    %c0_i32 = arith.constant 0 : i32
    %c0_i32_0 = arith.constant 0 : i32
    %c0_i32_1 = arith.constant 0 : i32
    return %c0_i32, %c0_i32_0 : i32, i32
  }
  func.func @transform_2(%arg0: i32, %arg1: memref<2x8xi32, #tpu.memory_space<smem>>) -> (i32, i32) {
    %c0_i32 = arith.constant 0 : i32
    %c0_i32_0 = arith.constant 0 : i32
    %c0_i32_1 = arith.constant 0 : i32
    return %c0_i32, %c0_i32_0 : i32, i32
  }
  func.func @transform_3(%arg0: i32, %arg1: memref<2x8xi32, #tpu.memory_space<smem>>) -> (i32, i32) {
    %c0_i32 = arith.constant 0 : i32
    %c0_i32_0 = arith.constant 0 : i32
    %c0_i32_1 = arith.constant 0 : i32
    return %c0_i32, %c0_i32_0 : i32, i32
  }
  func.func @transform_5(%arg0: i32, %arg1: memref<2x8xi32, #tpu.memory_space<smem>>) -> (i32, i32, i32) {
    %c0_i32 = arith.constant 0 : i32
    %c0_i32_0 = arith.constant 0 : i32
    %c0_i32_1 = arith.constant 0 : i32
    return %arg0, %c0_i32, %c0_i32_0 : i32, i32, i32
  }
}

</mosaic_0001>

<bundles_post_ra>
// kernel: tpu_custom_call.1
= control target key start
LH: loop header
LB: loop body
LE: loop exit
PB: predicated region body
PF: predicated region fallthrough
CT: control target
= control target key end

     0   :  { %s1273_s0 = inlined_call_operand.hbm [shape: s32[2,8], index: 0, kind: input, shape index: {}]   ;;  %s1274_s1 = inlined_call_operand.hbm [shape: f32[8,128], index: 1, kind: input, shape index: {}]   ;;  %s1275_s2 = inlined_call_operand.vmem [shape: f32[1,128], index: 2, kind: input, shape index: {}]   ;;  %s1276_s3 = inlined_call_operand.vmem [shape: f32[1,128], index: 3, kind: input, shape index: {}]   ;;  %s1277_s4 = inlined_call_operand.vmem [shape: f32[1,128], index: 4, kind: input, shape index: {}]   ;;  %s1278_s5 = inlined_call_operand.hbm [shape: f32[256,128], index: 5, kind: input, shape index: {}]   ;;  %s1279_s6 = inlined_call_operand.hbm [shape: bf16[2,8,128], index: 6, kind: output, shape index: {}]  }
   0x1   :  { %1288 = sst [smem:[#allocation43_spill]] %s1274_s1  ;;  %s622_s23 = scalar_lea.hbm %s1273_s0, 32 }
   0x2   :  { %p623_p0 = scmp.ne.s32.totalorder %s1273_s0, %s622_s23  ;;  %p626_p1 = scmp.lt.u32.totalorder %s622_s23, %s1273_s0 }
   0x4   :  { %p628_p2 = pnand %p626_p1, %p623_p0 }
   0x6   :  { %631 = shalt.err (!%p628_p2)  }
   0x7   :  { %s938_s28 = smov [#allocation5]  }
   0x8   :  { %12 = dma.hbm_to_smem %s1273_s0, 32, %s938_s28, [#allocation4] }
   0x9   :  { %896 = dma.done.wait [#allocation4], 32 }
   0xa   :  { %897 = vsyncadd [#allocation4], 4294967264 }
   0xb   :  { %14 = sfence }
   0xc   :  { %15 = vsyncpa [#allocation7], 0 }
   0xd   :  { %16 = vsyncpa [#allocation8], 0 }
   0xe   :  { %18 = vsyncpa [#allocation8 + $0x1], 0  ;;  %s996_s7 = smov 0   ;;  %s998_s8 = smov 0  }
   0xf   :  { %s1000_s9 = smov 0   ;;  %s1002_s10 = smov 0  }
  0x10 LB: > { %1289 = sst [smem:[#allocation39_spill]] %s932_s9  ;;  %s1017_s0 = sadd.s32 4294967295, %s936_s10   ;;  %s936_s10 = sphi %s1002_s10, %s1305_s10   ;;  %s932_s9 = sphi %s1000_s9, %s1307_s9   ;;  %s928_s8 = sphi %s998_s8, %s1309_s8   ;;  %s924_s7 = sphi %s996_s7, %s1308_s7  }
  0x11   : > { %s531_s11 = sadd.s32 4294967294, %s936_s10   ;;  %s1021_s12 = sadd.s32 1, %s936_s10  }
  0x12   : > { %1290 = sst [smem:[#allocation40_spill]] %s1021_s12  ;;  %s115_s13 = sadd.s32 1, %s932_s9 }
  0x13   : > { %s112_s14 = ssub.s32 %s936_s10, %s1021_s12  ;;  %p125_p3 = scmp.ne.s32.totalorder %s932_s9, %s928_s8 }
  0x14   : > { %p113_p4 = scmp.eq.s32.totalorder %s112_s14, 0  ;;  %p126_p5 = scmp.eq.s32.totalorder %s1017_s0, 1 }
  0x15   : > { %p131_p6 = scmp.ne.s32.totalorder %s928_s8, %s924_s7  ;;  %p132_p7 = scmp.eq.s32.totalorder %s531_s11, 1 }
  0x16   : > { %s1032_s15 = scalar_select %p113_p4, %s932_s9, %s115_s13  }
  0x17   : > { %p1034_p8 = por %p126_p5, %p125_p3  ;;  %p1038_p9 = por %p132_p7, %p131_p6 }
  0x18   : > { %1291 = sst [smem:[#allocation41_spill]] %s1032_s15  ;;  %p532_p10 = scmp.ge.s32.totalorder %s936_s10, 1 }
  0x19   : > { %s1292_s16 = scalar_select %p1034_p8, 1, 0 }
  0x1a   : > { %s1293_s17 = scalar_select %p1038_p9, 1, 0 }
  0x1b   : > { %p139_p11 = scmp.lt.s32.totalorder %s936_s10, 3  ;;  %p1280_p12 = scmp.eq.s32.totalorder %s1017_s0, 0 }
  0x1c   : > { %1294 = sst [smem:[#allocation42_spill]] %s1293_s17  ;;  %s939_s19 = smov [#allocation6]  }
  0x1d   : > { %p1045_p13 = pnand %p532_p10, %p139_p11  ;;  %s152_s20 = sshll.u32 %s939_s19, 4  ;;  %s153_s20 = int_to_ptr.vmem [resolvable:$true] %s152_s20 }
  0x1e   : > { %s1297_s1 = sld [smem:[#allocation43_spill]] }
  0x1f   : > { %s1295_s18 = scalar_select %p1045_p13, 1, 0 }
  0x20   : > { %p567_p0 = pneg %p1045_p13 }
  0x22   : > { %p1053_p1 = pnand %p1280_p12, %p567_p0 }
  0x24   : > { %s632_s24 = scalar_lea.hbm %s1297_s1, 128  ;;  %p634_p3 = pneg %p1053_p1 }
  0x25   : > { %p633_p2 = scmp.ne.s32.totalorder %s1297_s1, %s632_s24  ;;  %p639_p6 = scmp.lt.u32.totalorder %s632_s24, %s1297_s1 }
  0x27   : > { %p635_p4 = pnand %p634_p3, %p633_p2 }
  0x29   : > { %p636_p5 = pneg %p635_p4 }
  0x2b   : > { %p641_p7 = pnand %p639_p6, %p636_p5 }
  0x2d   : > { %644 = shalt.err (!%p641_p7)
}
  0x2e   : > { %s645_s29 = scalar_lea.vmem %s153_s20, 128  ;;  %p653_p12 = scmp.lt.s32.totalorder %s153_s20, %s153_s20 }
  0x2f   : > { %p646_p10 = scmp.ne.s32.totalorder %s153_s20, %s645_s29  ;;  %p654_p9 = scmp.lt.s32.totalorder %s645_s29, %s645_s29 }
  0x31   : > { %p648_p11 = pnand %p646_p10, %p634_p3  ;;  %p655_p8 = por %p654_p9, %p653_p12 }
  0x33   : > { %p649_p0 = pneg %p648_p11 }
  0x35   : > { %p656_p13 = pnand %p655_p8, %p649_p0 }
  0x37   : > { %659 = shalt.err (!%p656_p13)
}
  0x38   : > { %570 = dma.hbm_to_vmem [thread:$0]  (!%p1053_p1), %s1297_s1, 128, %s153_s20, [#allocation7]  }
  0x39   : > { %p1298_p2 = scmp.ne.s32.totalorder %s1295_s18, 0 }
  0x3a   : > { %p1299_p4 = scmp.eq.s32.totalorder (!%p1298_p2), %s1017_s0, 0 }
  0x3b   : > { %174 = sbr.rel (%p1298_p2) target bundleno = 596 (0x254), region = 36 }
  0x42   : > { %899 = dma.done.wait (%p1299_p4), [#allocation7], 128   ;;  %p1300_p3 = pmov %p1299_p4 }
  0x43   : > { %s1283_s13 = sand.u32 1, %s928_s8   ;;  %s1081_s14 = sshll.u32 %s1017_s0, 7 }
  0x44   : > { %901 = vsyncadd (%p1300_p3), [#allocation7], 4294967168  ;;  %s1085_s19 = sshll.u32 %s1283_s13, 2  ;;  %s196_s18 = sld [smem:[#allocation5 + %s1081_s14]] }
  0x45   : > { %s940_s20 = smov [#allocation2]   ;;  %s210_s22 = sadd.s32 1, %s1081_s14 }
  0x46   : > { %s206_s21 = sshll.u32 %s940_s20, 4  ;;  %s1091_s23 = sld [smem:[#allocation5 + %s210_s22]]  ;;  %s1089_s21 = int_to_ptr.vmem [resolvable:$true] %s206_s21 }
  0x47   : > { %s227_s24 = sadd.s32 2, %s1081_s14  ;;  %s941_s25 = smov [#allocation2 + $0x1]  }
  0x48   : > { %s223_s26 = sshll.u32 %s941_s25, 4  ;;  %s1094_s27 = sld [smem:[#allocation5 + %s227_s24]]  ;;  %s1096_s26 = int_to_ptr.vmem [resolvable:$true] %s223_s26 }
  0x49   : > { %s1104_s15 = scalar_lea.hbm %s1278_s5, 4096 }
  0x4a   : > { %s538_s28 = sshll.u32 %s196_s18, 4 }
  0x4b   : > { %s198_s11 = scalar_lea.hbm %s1278_s5, %s538_s28 }
  0x4c   : > { %s660_s13 = scalar_lea.hbm %s198_s11, 16  ;;  %p663_p9 = scmp.lt.u32.totalorder %s198_s11, %s1278_s5 }
  0x4d   : > { %p661_p8 = scmp.ne.s32.totalorder %s198_s11, %s660_s13  ;;  %p664_p12 = scmp.lt.u32.totalorder %s1104_s15, %s660_s13 }
  0x4e   : > { %p666_p1 = scmp.lt.u32.totalorder %s660_s13, %s198_s11 }
  0x4f   : > { %p665_p13 = por %p664_p12, %p663_p9 }
  0x51   : > { %p667_p5 = por %p666_p1, %p665_p13 }
  0x53   : > { %p668_p6 = pnand %p667_p5, %p661_p8 }
  0x55   : > { %671 = shalt.err (!%p668_p6)  }
  0x56   : > { %s672_s18 = scalar_lea.vmem %s1089_s21, 16  ;;  %s1113_s1 = scalar_lea.vmem %s1089_s21, 128 }
  0x57   : > { %p673_p7 = scmp.ne.s32.totalorder %s1089_s21, %s672_s18  ;;  %p677_p10 = scmp.lt.s32.totalorder %s1089_s21, %s1089_s21 }
  0x58   : > { %p678_p11 = scmp.lt.s32.totalorder %s1113_s1, %s672_s18 }
  0x5a   : > { %p679_p0 = por %p678_p11, %p677_p10 }
  0x5c   : > { %p680_p2 = pnand %p679_p0, %p673_p7 }
  0x5e   : > { %683 = shalt.err (!%p680_p2)  }
  0x5f   : > { %209 = dma.hbm_to_vmem [thread:$0]  %s198_s11, 16, %s1089_s21, [#allocation3] }
  0x60   : > { %s539_s9 = sshll.u32 %s1091_s23, 4  ;;  %s942_s13 = smov [#allocation2 + $0x2]  }
  0x61   : > { %s240_s24 = sshll.u32 %s942_s13, 4  ;;  %s213_s29 = scalar_lea.hbm %s1278_s5, %s539_s9  ;;  %s1123_s24 = int_to_ptr.vmem [resolvable:$true] %s240_s24 }
  0x62   : > { %s684_s30 = scalar_lea.hbm %s213_s29, 16  ;;  %p687_p3 = scmp.lt.u32.totalorder %s213_s29, %s1278_s5 }
  0x63   : > { %p685_p4 = scmp.ne.s32.totalorder %s213_s29, %s684_s30  ;;  %p688_p8 = scmp.lt.u32.totalorder %s1104_s15, %s684_s30 }
  0x64   : > { %p690_p12 = scmp.lt.u32.totalorder %s684_s30, %s213_s29 }
  0x65   : > { %p689_p9 = por %p688_p8, %p687_p3 }
  0x67   : > { %p691_p13 = por %p690_p12, %p689_p9 }
  0x69   : > { %p692_p1 = pnand %p691_p13, %p685_p4 }
  0x6b   : > { %695 = shalt.err (!%p692_p1)  }
  0x6c   : > { %s696_s23 = scalar_lea.vmem %s1096_s26, 16  ;;  %p701_p6 = scmp.lt.s32.totalorder %s1096_s26, %s1089_s21 }
  0x6d   : > { %p697_p5 = scmp.ne.s32.totalorder %s1096_s26, %s696_s23  ;;  %p702_p7 = scmp.lt.s32.totalorder %s1113_s1, %s696_s23 }
  0x6f   : > { %p703_p10 = por %p702_p7, %p701_p6 }
  0x71   : > { %p704_p11 = pnand %p703_p10, %p697_p5 }
  0x73   : > { %707 = shalt.err (!%p704_p11)  }
  0x74   : > { %226 = dma.hbm_to_vmem [thread:$0]  %s213_s29, 16, %s1096_s26, [#allocation3 + $0x1] }
  0x75   : > { %s540_s11 = sshll.u32 %s1094_s27, 4  ;;  %s244_s18 = sadd.s32 3, %s1081_s14 }
  0x76   : > { %s230_s25 = scalar_lea.hbm %s1278_s5, %s540_s11  ;;  %s1140_s28 = sld [smem:[#allocation5 + %s244_s18]] }
  0x77   : > { %s708_s30 = scalar_lea.hbm %s230_s25, 16  ;;  %p711_p2 = scmp.lt.u32.totalorder %s230_s25, %s1278_s5 }
  0x78   : > { %p709_p0 = scmp.ne.s32.totalorder %s230_s25, %s708_s30  ;;  %p712_p4 = scmp.lt.u32.totalorder %s1104_s15, %s708_s30 }
  0x79   : > { %p714_p8 = scmp.lt.u32.totalorder %s708_s30, %s230_s25 }
  0x7a   : > { %p713_p3 = por %p712_p4, %p711_p2 }
  0x7c   : > { %p715_p9 = por %p714_p8, %p713_p3 }
  0x7e   : > { %p716_p12 = pnand %p715_p9, %p709_p0 }
  0x80   : > { %719 = shalt.err (!%p716_p12)  }
  0x81   : > { %s720_s26 = scalar_lea.vmem %s1123_s24, 16  ;;  %p725_p1 = scmp.lt.s32.totalorder %s1123_s24, %s1089_s21 }
  0x82   : > { %p721_p13 = scmp.ne.s32.totalorder %s1123_s24, %s720_s26  ;;  %p726_p5 = scmp.lt.s32.totalorder %s1113_s1, %s720_s26 }
  0x84   : > { %p727_p6 = por %p726_p5, %p725_p1 }
  0x86   : > { %p728_p7 = pnand %p727_p6, %p721_p13 }
  0x88   : > { %731 = shalt.err (!%p728_p7)  }
  0x89   : > { %243 = dma.hbm_to_vmem [thread:$0]  %s230_s25, 16, %s1123_s24, [#allocation3 + $0x2] }
  0x8a   : > { %s261_s27 = sadd.s32 4, %s1081_s14  ;;  %s943_s29 = smov [#allocation2 + $0x3]  }
  0x8b   : > { %s257_s23 = sshll.u32 %s943_s29, 4  ;;  %s262_s11 = sld [smem:[#allocation5 + %s261_s27]]  ;;  %s258_s23 = int_to_ptr.vmem [resolvable:$true] %s257_s23 }
  0x8c   : > { %s944_s18 = smov [#allocation2 + $0x4]   ;;  %s278_s13 = sadd.s32 5, %s1081_s14 }
  0x8d   : > { %s274_s9 = sshll.u32 %s944_s18, 4  ;;  %s541_s30 = sshll.u32 %s1140_s28, 4  ;;  %s1155_s9 = int_to_ptr.vmem [resolvable:$true] %s274_s9 }
  0x8e   : > { %s247_s26 = scalar_lea.hbm %s1278_s5, %s541_s30  ;;  %s1160_s12 = sld [smem:[#allocation5 + %s278_s13]] }
  0x8f   : > { %s732_s17 = scalar_lea.hbm %s247_s26, 16  ;;  %p735_p11 = scmp.lt.u32.totalorder %s247_s26, %s1278_s5 }
  0x90   : > { %p733_p10 = scmp.ne.s32.totalorder %s247_s26, %s732_s17  ;;  %p736_p0 = scmp.lt.u32.totalorder %s1104_s15, %s732_s17 }
  0x91   : > { %p738_p4 = scmp.lt.u32.totalorder %s732_s17, %s247_s26 }
  0x92   : > { %p737_p2 = por %p736_p0, %p735_p11 }
  0x94   : > { %p739_p3 = por %p738_p4, %p737_p2 }
  0x96   : > { %p740_p8 = pnand %p739_p3, %p733_p10 }
  0x98   : > { %743 = shalt.err (!%p740_p8)  }
  0x99   : > { %s744_s28 = scalar_lea.vmem %s258_s23, 16  ;;  %p749_p12 = scmp.lt.s32.totalorder %s258_s23, %s1089_s21 }
  0x9a   : > { %p745_p9 = scmp.ne.s32.totalorder %s258_s23, %s744_s28  ;;  %p750_p13 = scmp.lt.s32.totalorder %s1113_s1, %s744_s28 }
  0x9c   : > { %p751_p1 = por %p750_p13, %p749_p12 }
  0x9e   : > { %p752_p5 = pnand %p751_p1, %p745_p9 }
  0xa0   : > { %755 = shalt.err (!%p752_p5)  }
  0xa1   : > { %260 = dma.hbm_to_vmem [thread:$0]  %s247_s26, 16, %s258_s23, [#allocation3 + $0x3] }
  0xa2   : > { %s542_s27 = sshll.u32 %s262_s11, 4  ;;  %s945_s17 = smov [#allocation2 + $0x5]  }
  0xa3   : > { %s264_s13 = scalar_lea.hbm %s1278_s5, %s542_s27  ;;  %s291_s30 = sshll.u32 %s945_s17, 4  ;;  %s292_s30 = int_to_ptr.vmem [resolvable:$true] %s291_s30 }
  0xa4   : > { %s756_s20 = scalar_lea.hbm %s264_s13, 16  ;;  %p759_p7 = scmp.lt.u32.totalorder %s264_s13, %s1278_s5 }
  0xa5   : > { %p757_p6 = scmp.ne.s32.totalorder %s264_s13, %s756_s20  ;;  %p760_p10 = scmp.lt.u32.totalorder %s1104_s15, %s756_s20 }
  0xa6   : > { %p762_p0 = scmp.lt.u32.totalorder %s756_s20, %s264_s13 }
  0xa7   : > { %p761_p11 = por %p760_p10, %p759_p7 }
  0xa9   : > { %p763_p2 = por %p762_p0, %p761_p11 }
  0xab   : > { %p764_p4 = pnand %p763_p2, %p757_p6 }
  0xad   : > { %767 = shalt.err (!%p764_p4)  }
  0xae   : > { %s768_s23 = scalar_lea.vmem %s1155_s9, 16  ;;  %p773_p8 = scmp.lt.s32.totalorder %s1155_s9, %s1089_s21 }
  0xaf   : > { %p769_p3 = scmp.ne.s32.totalorder %s1155_s9, %s768_s23  ;;  %p774_p9 = scmp.lt.s32.totalorder %s1113_s1, %s768_s23 }
  0xb1   : > { %p775_p12 = por %p774_p9, %p773_p8 }
  0xb3   : > { %p776_p13 = pnand %p775_p12, %p769_p3 }
  0xb5   : > { %779 = shalt.err (!%p776_p13)  }
  0xb6   : > { %277 = dma.hbm_to_vmem [thread:$0]  %s264_s13, 16, %s1155_s9, [#allocation3 + $0x4] }
  0xb7   : > { %s295_s11 = sadd.s32 6, %s1081_s14  ;;  %s543_s26 = sshll.u32 %s1160_s12, 4 }
  0xb8   : > { %s296_s25 = sld [smem:[#allocation5 + %s295_s11]]  ;;  %s281_s29 = scalar_lea.hbm %s1278_s5, %s543_s26 }
  0xb9   : > { %s780_s18 = scalar_lea.hbm %s281_s29, 16  ;;  %p783_p5 = scmp.lt.u32.totalorder %s281_s29, %s1278_s5 }
  0xba   : > { %p781_p1 = scmp.ne.s32.totalorder %s281_s29, %s780_s18  ;;  %p784_p6 = scmp.lt.u32.totalorder %s1104_s15, %s780_s18 }
  0xbb   : > { %p786_p10 = scmp.lt.u32.totalorder %s780_s18, %s281_s29 }
  0xbc   : > { %p785_p7 = por %p784_p6, %p783_p5 }
  0xbe   : > { %p787_p11 = por %p786_p10, %p785_p7 }
  0xc0   : > { %p788_p0 = pnand %p787_p11, %p781_p1 }
  0xc2   : > { %791 = shalt.err (!%p788_p0)  }
  0xc3   : > { %s792_s9 = scalar_lea.vmem %s292_s30, 16  ;;  %p797_p4 = scmp.lt.s32.totalorder %s292_s30, %s1089_s21 }
  0xc4   : > { %p793_p2 = scmp.ne.s32.totalorder %s292_s30, %s792_s9  ;;  %p798_p3 = scmp.lt.s32.totalorder %s1113_s1, %s792_s9 }
  0xc6   : > { %p799_p8 = por %p798_p3, %p797_p4 }
  0xc8   : > { %p800_p9 = pnand %p799_p8, %p793_p2 }
  0xca   : > { %803 = shalt.err (!%p800_p9)  }
  0xcb   : > { %294 = dma.hbm_to_vmem [thread:$0]  %s281_s29, 16, %s292_s30, [#allocation3 + $0x5] }
  0xcc   : > { %s946_s12 = smov [#allocation2 + $0x6]   ;;  %s312_s22 = sadd.s32 7, %s1081_s14 }
  0xcd   : > { %s308_s13 = sshll.u32 %s946_s12, 4  ;;  %s313_s24 = sld [smem:[#allocation5 + %s312_s22]]  ;;  %s309_s13 = int_to_ptr.vmem [resolvable:$true] %s308_s13 }
  0xce   : > { %s544_s23 = sshll.u32 %s296_s25, 4  ;;  %s947_s11 = smov [#allocation2 + $0x7]  }
  0xcf   : > { %s325_s26 = sshll.u32 %s947_s11, 4  ;;  %s298_s18 = scalar_lea.hbm %s1278_s5, %s544_s23  ;;  %s326_s26 = int_to_ptr.vmem [resolvable:$true] %s325_s26 }
  0xd0   : > { %s804_s17 = scalar_lea.hbm %s298_s18, 16  ;;  %p807_p13 = scmp.lt.u32.totalorder %s298_s18, %s1278_s5 }
  0xd1   : > { %p805_p12 = scmp.ne.s32.totalorder %s298_s18, %s804_s17  ;;  %p808_p1 = scmp.lt.u32.totalorder %s1104_s15, %s804_s17 }
  0xd2   : > { %p810_p6 = scmp.lt.u32.totalorder %s804_s17, %s298_s18 }
  0xd3   : > { %p809_p5 = por %p808_p1, %p807_p13 }
  0xd5   : > { %p811_p7 = por %p810_p6, %p809_p5 }
  0xd7   : > { %p812_p10 = pnand %p811_p7, %p805_p12 }
  0xd9   : > { %815 = shalt.err (!%p812_p10)  }
  0xda   : > { %s816_s14 = scalar_lea.vmem %s309_s13, 16  ;;  %p821_p0 = scmp.lt.s32.totalorder %s309_s13, %s1089_s21 }
  0xdb   : > { %p817_p11 = scmp.ne.s32.totalorder %s309_s13, %s816_s14  ;;  %p822_p2 = scmp.lt.s32.totalorder %s1113_s1, %s816_s14 }
  0xdd   : > { %p823_p4 = por %p822_p2, %p821_p0 }
  0xdf   : > { %p824_p3 = pnand %p823_p4, %p817_p11 }
  0xe1   : > { %827 = shalt.err (!%p824_p3)  }
  0xe2   : > { %311 = dma.hbm_to_vmem [thread:$0]  %s298_s18, 16, %s309_s13, [#allocation3 + $0x6] }
  0xe3   : > { %s545_s30 = sshll.u32 %s313_s24, 4 }
  0xe4   : > { %s315_s12 = scalar_lea.hbm %s1278_s5, %s545_s30 }
  0xe5   : > { %s828_s22 = scalar_lea.hbm %s315_s12, 16  ;;  %p831_p9 = scmp.lt.u32.totalorder %s315_s12, %s1278_s5 }
  0xe6   : > { %p829_p8 = scmp.ne.s32.totalorder %s315_s12, %s828_s22  ;;  %p832_p12 = scmp.lt.u32.totalorder %s1104_s15, %s828_s22 }
  0xe7   : > { %p834_p1 = scmp.lt.u32.totalorder %s828_s22, %s315_s12 }
  0xe8   : > { %p833_p13 = por %p832_p12, %p831_p9 }
  0xea   : > { %p835_p5 = por %p834_p1, %p833_p13 }
  0xec   : > { %p836_p6 = pnand %p835_p5, %p829_p8 }
  0xee   : > { %839 = shalt.err (!%p836_p6)  }
  0xef   : > { %s840_s13 = scalar_lea.vmem %s326_s26, 16  ;;  %p845_p10 = scmp.lt.s32.totalorder %s326_s26, %s1089_s21 }
  0xf0   : > { %p841_p7 = scmp.ne.s32.totalorder %s326_s26, %s840_s13  ;;  %p846_p11 = scmp.lt.s32.totalorder %s1113_s1, %s840_s13 }
  0xf2   : > { %p847_p0 = por %p846_p11, %p845_p10 }
  0xf4   : > { %p848_p2 = pnand %p847_p0, %p841_p7 }
  0xf6   : > { %851 = shalt.err (!%p848_p2)  }
  0xf7   : > { %328 = dma.hbm_to_vmem [thread:$0]  %s315_s12, 16, %s326_s26, [#allocation3 + $0x7] }
  0xf8   : > { %s194_s24 = scalar_lea.vmem [#allocation9], %s1085_s19 }
  0xf9   : > { %902 = dma.done.wait [#allocation3], 16 }
  0xfa   : > { %903 = vsyncadd [#allocation3], 4294967280 }
  0xfb   : > { %904 = dma.done.wait [#allocation3 + $0x1], 16 }
  0xfc   : > { %905 = vsyncadd [#allocation3 + $0x1], 4294967280 }
  0xfd   : > { %906 = dma.done.wait [#allocation3 + $0x2], 16 }
  0xfe   : > { %907 = vsyncadd [#allocation3 + $0x2], 4294967280 }
  0xff   : > { %908 = dma.done.wait [#allocation3 + $0x3], 16 }
 0x100   : > { %909 = vsyncadd [#allocation3 + $0x3], 4294967280 }
 0x101   : > { %910 = dma.done.wait [#allocation3 + $0x4], 16 }
 0x102   : > { %911 = vsyncadd [#allocation3 + $0x4], 4294967280 }
 0x103   : > { %912 = dma.done.wait [#allocation3 + $0x5], 16 }
 0x104   : > { %913 = vsyncadd [#allocation3 + $0x5], 4294967280 }
 0x105   : > { %914 = dma.done.wait [#allocation3 + $0x6], 16 }
 0x106   : > { %915 = vsyncadd [#allocation3 + $0x6], 4294967280 }
 0x107   : > { %916 = dma.done.wait [#allocation3 + $0x7], 16 }
 0x108   : > { %917 = vsyncadd [#allocation3 + $0x7], 4294967280  ;;  %v346_v0 = vld [vmem:[#allocation2] sm:$0xff]  ;;  %v347_v1 = vld [vmem:[#allocation6] sm:$0xff]  ;;  %s550_s18 = sshll.u32 %s1017_s0, 6  ;;  %s401_s17 = sshll.u32 %s194_s24, 4  ;;  %s1229_s17 = int_to_ptr.vmem [resolvable:$true] %s401_s17 }
 0x109   : > { %v546_v2 = vld [vmem:[%s1275_s2] ss:$0 sm:$0xff]  ;;  %v348_v3 = vadd.f32 %v347_v1, %v346_v0  ;;  %s1227_s14 = scalar_lea.hbm %s1279_s6, %s550_s18  ;;  %s1301_s30 = sand.u32 1, %s928_s8  }
 0x10a   : > { %v547_v13 = vld [vmem:[%s1276_s3] ss:$0 sm:$0xff]  ;;  %s388_s25 = scalar_lea.sflag [#allocation8], %s1301_s30  ;;  %s852_s29 = scalar_lea.vmem %s1229_s17, 64 }
 0x10b   : > { %v356_v4 = vadd.f32 %v546_v2, %v348_v3  ;;  %v548_v15 = vld [vmem:[%s1277_s4] ss:$0 sm:$0xff]  ;;  %p853_p4 = scmp.ne.s32.totalorder %s1229_s17, %s852_s29  ;;  %p1302_p3 = scmp.ne.s32.totalorder %s1292_s16, 0 }
 0x10c   : > { %s948_s0 = smov [#allocation9]  }
 0x10d   : > { %357 = vadd.xlane.f32.xlu0 %v356_v4  ;;  %p854_p8 = pnand %p853_p4, %p1302_p3  ;;  %s856_s12 = sshll.u32 %s948_s0, 4  ;;  %s857_s12 = int_to_ptr.vmem [resolvable:$false] %s856_s12 }
 0x10e   : > { %s858_s22 = scalar_lea.vmem %s857_s12, 128  ;;  %p859_p12 = scmp.lt.s32.totalorder %s1229_s17, %s857_s12 }
 0x10f   : > { %p855_p9 = pneg %p854_p8  ;;  %p860_p13 = scmp.lt.s32.totalorder %s858_s22, %s852_s29 }
 0x111   : > { %p861_p1 = por %p860_p13, %p859_p12 }
 0x113   : > { %p862_p5 = pnand %p861_p1, %p855_p9 }
 0x19a   : > { %v358_v5 = vpop.xlane.xlu0 %357 }
 0x19b   : > { %v360_v6 = vmul.f32 0.0078125, %v358_v5 }
 0x19d   : > { %v361_v7 = vsub.f32 %v356_v4, %v360_v6 }
 0x19f   : > { %v362_v8 = vmul.f32 %v361_v7, %v361_v7 }
 0x1a1   : > { %363 = vadd.xlane.f32.xlu0 %v362_v8 }
 0x22e   : > { %v364_v9 = vpop.xlane.xlu0 %363 }
 0x22f   : > { %v365_v10 = vmul.f32 0.0078125, %v364_v9 }
 0x231   : > { %v366_v11 = vadd.f32 1e-12, %v365_v10 }
 0x233   : > { %620 = vrsqrt.f32 %v366_v11 }
 0x23d   : > { %v621_v12 = vpop.eup %620 }
 0x23e   : > { %v368_v14 = vmul.f32 %v621_v12, %v361_v7 }
 0x240   : > { %v376_v16 = vmul.f32 %v547_v13, %v368_v14 }
 0x242   : > { %v384_v17 = vadd.f32 %v548_v15, %v376_v16 }
 0x244   : > { %v385_v18 = vpack.c.bf16 %v384_v17, %v384_v17 }
 0x246   : > { %386 = vst [vmem:[%s194_s24] sm:$0xf] %v385_v18 }
 0x247   : > { %865 = shalt.err (!%p862_p5)
}
 0x248   : > { %s866_s19 = scalar_lea.hbm %s1227_s14, 64  ;;  %s870_s13 = scalar_lea.hbm %s1279_s6, 128 }
 0x249   : > { %p867_p6 = scmp.ne.s32.totalorder %s1227_s14, %s866_s19  ;;  %p871_p11 = scmp.lt.u32.totalorder %s1227_s14, %s1279_s6 }
 0x24a   : > { %p872_p0 = scmp.lt.u32.totalorder %s870_s13, %s866_s19  ;;  %p874_p4 = scmp.lt.u32.totalorder %s866_s19, %s1227_s14 }
 0x24b   : > { %p868_p7 = pnand %p867_p6, %p1302_p3 }
 0x24c   : > { %p873_p2 = por %p872_p0, %p871_p11 }
 0x24d   : > { %p869_p10 = pneg %p868_p7 }
 0x24e   : > { %p875_p8 = por %p874_p4, %p873_p2 }
 0x250   : > { %p876_p9 = pnand %p875_p8, %p869_p10 }
 0x252   : > { %879 = shalt.err (!%p876_p9)
}
 0x253   : > { %565 = dma.vmem_to_hbm [thread:$0]  (%p1302_p3), %s1229_s17, 64, %s1227_s14, %s388_s25  }
 0x254 PF: > { %s1303_s21 = sld [smem:[#allocation42_spill]]  ;;  %p577_p12 = scmp.ge.s32.totalorder %s936_s10, 2 }
 0x255   : > { %s413_s1 = sand.u32 1, %s924_s7  }
 0x256   : > { %s414_s26 = scalar_lea.sflag [#allocation8], %s413_s1 }
 0x25a   : > { %p1304_p13 = scmp.ne.s32.totalorder %s1303_s21, 0 }
 0x25c   : > { %p572_p1 = pnand %p577_p12, %p1304_p13 }
 0x25e   : > { %919 = dma.done.wait (!%p572_p1), %s414_s26, 64  }
 0x25f   : > { %921 = vsyncadd (!%p572_p1), %s414_s26, 4294967232  ;;  %s1305_s10 = sld [smem:[#allocation40_spill]]  ;;  %s1306_s28 = sld [smem:[#allocation39_spill]] }
 0x260   : > { %s1307_s9 = sld [smem:[#allocation41_spill]]  ;;  %s1308_s7 = smov %s928_s8 }
 0x265   : > { %p21_p5 = scmp.ge.s32.totalorder %s1305_s10, 4   ;;  %s1309_s8 = smov %s1306_s28 }
 0x267   :  { %23 = sbr.rel (!%p21_p5) target bundleno = 16 (0x10), region = 134 }
 0x26e   :  { %419 = vsyncpa [#allocation7], 1 }
 0x26f   :  { %421 = vsyncpa [#allocation7 + $0x1], 1 }
 0x270   :  { %422 = vsyncpa [#allocation8], 1 }
 0x271   :  { %424 = vsyncpa [#allocation8 + $0x1], 1 }
 0x272   :  { %425 = vsyncmov [#allocation3] }
 0x275   :  { %s426_s16 = vpop.sfrf %425 }
 0x276   :  { %p553_p3 = scmp.ne.s32.totalorder %s426_s16, 0 }
 0x278   :  { %430 = shalt.err (%p553_p3)  }
 0x279   :  { %432 = vsyncmov [#allocation3 + $0x1] }
 0x27c   :  { %s433_s27 = vpop.sfrf %432 }
 0x27d   :  { %p554_p6 = scmp.ne.s32.totalorder %s433_s27, 0 }
 0x27f   :  { %437 = shalt.err (%p554_p6)  }
 0x280   :  { %439 = vsyncmov [#allocation3 + $0x2] }
 0x283   :  { %s440_s18 = vpop.sfrf %439 }
 0x284   :  { %p555_p7 = scmp.ne.s32.totalorder %s440_s18, 0 }
 0x286   :  { %444 = shalt.err (%p555_p7)  }
 0x287   :  { %446 = vsyncmov [#allocation3 + $0x3] }
 0x28a   :  { %s447_s17 = vpop.sfrf %446 }
 0x28b   :  { %p556_p10 = scmp.ne.s32.totalorder %s447_s17, 0 }
 0x28d   :  { %451 = shalt.err (%p556_p10)  }
 0x28e   :  { %453 = vsyncmov [#allocation3 + $0x4] }
 0x291   :  { %s454_s2 = vpop.sfrf %453 }
 0x292   :  { %p557_p11 = scmp.ne.s32.totalorder %s454_s2, 0 }
 0x294   :  { %458 = shalt.err (%p557_p11)  }
 0x295   :  { %460 = vsyncmov [#allocation3 + $0x5] }
 0x298   :  { %s461_s3 = vpop.sfrf %460 }
 0x299   :  { %p558_p0 = scmp.ne.s32.totalorder %s461_s3, 0 }
 0x29b   :  { %465 = shalt.err (%p558_p0)  }
 0x29c   :  { %467 = vsyncmov [#allocation3 + $0x6] }
 0x29f   :  { %s468_s4 = vpop.sfrf %467 }
 0x2a0   :  { %p559_p2 = scmp.ne.s32.totalorder %s468_s4, 0 }
 0x2a2   :  { %472 = shalt.err (%p559_p2)  }
 0x2a3   :  { %474 = vsyncmov [#allocation3 + $0x7] }
 0x2a6   :  { %s475_s5 = vpop.sfrf %474 }
 0x2a7   :  { %p560_p4 = scmp.ne.s32.totalorder %s475_s5, 0 }
 0x2a9   :  { %479 = shalt.err (%p560_p4)  }

</bundles_post_ra>
